<compile_context>
chip_gen: v7x
topology: tpu7x:2x2x1
jax: 0.10.0
libtpu: 0.0.40
codegen_flags: <defaults>
</compile_context>

<pallas_src>
from functools import partial

import jax
import jax.numpy as jnp
from jax.experimental import pallas as pl
from jax.experimental.pallas import tpu as pltpu


def _round_up(a, m):
    return (a + m - 1) // m * m


def conv2d_kernel(x_ref, w_ref, b_ref, o_ref, *, kH, kW, W, L):
    """x_ref: (ICp, P) flat images; w_ref: (kH*kW, OCp, ICp); b_ref: (OCp, 1).

    Accumulates one small MXU matmul per tap (static lane-slice of the flat
    image), adds bias, casts and stores lane-dense (OCp, L)."""
    x = x_ref[...]                                   # (ICp, P), a handful of vregs
    acc = jnp.zeros(o_ref.shape, dtype=jnp.float32)  # (OCp, L) f32 accumulator
    t = 0
    for kh in range(kH):
        for kw in range(kW):
            s = kh * W + kw                          # static tap offset
            acc = acc + jnp.dot(w_ref[t], x[:, s:s + L],
                                preferred_element_type=jnp.float32)
            t += 1
    acc = acc + b_ref[...]                           # (OCp, 1) broadcasts over lanes
    o_ref[...] = acc.astype(o_ref.dtype)             # unmasked full-width store


@partial(jax.jit, static_argnames=("stride",))
def conv2d_pallas(x, w, b, stride=(1, 1)):
    """'valid' (no padding) 2D convolution with bias, NCHW in / NCHW out."""
    N, IC, H, W = x.shape
    OC, IC2, kH, kW = w.shape
    assert IC == IC2
    sH, sW = stride
    OH = (H - kH) // sH + 1
    OW = (W - kW) // sW + 1
    NHW = N * H * W

    # Channel padding to full sublane tiles; lane padding to full 128-lane vregs.
    ICp = _round_up(max(IC, 8), 8)
    OCp = _round_up(max(OC, 8), 8)
    L = _round_up(NHW, 128)                          # output lane dim (multiple of 128)
    s_max = (kH - 1) * W + (kW - 1)                  # largest tap offset
    P = _round_up(L + s_max, 128)                    # input lane dim (all taps in bounds)

    # ---- wrapper-side layout plumbing (fused under this jit) ----
    x_flat = jnp.transpose(x, (1, 0, 2, 3)).reshape(IC, NHW)
    x_flat = jnp.pad(x_flat, ((0, ICp - IC), (0, P - NHW)))          # (ICp, P)
    # Per-tap weight tiles: w_taps[kh*kW + kw, oc, ic] = w[oc, ic, kh, kw].
    w_taps = jnp.transpose(w, (2, 3, 0, 1)).reshape(kH * kW, OC, IC)
    w_taps = jnp.pad(w_taps, ((0, 0), (0, OCp - OC), (0, ICp - IC)))  # (k*k, OCp, ICp)
    b2 = jnp.pad(b, (0, OCp - OC)).reshape(OCp, 1).astype(jnp.float32)

    kernel = partial(conv2d_kernel, kH=kH, kW=kW, W=W, L=L)

    y = pl.pallas_call(
        kernel,
        out_shape=jax.ShapeDtypeStruct((OCp, L), x.dtype),
        in_specs=[
            pl.BlockSpec(memory_space=pltpu.MemorySpace.VMEM),  # flat images
            pl.BlockSpec(memory_space=pltpu.MemorySpace.VMEM),  # per-tap weights
            pl.BlockSpec(memory_space=pltpu.MemorySpace.VMEM),  # bias
        ],
        out_specs=pl.BlockSpec(memory_space=pltpu.MemorySpace.VMEM),
    )(x_flat, w_taps, b2)

    # Crop padding / select the valid (and, if strided, kept) output positions;
    # these fuse into a single XLA copy back to NCHW.
    y = y[:OC, :NHW].reshape(OC, N, H, W)
    y = y[:, :, :(OH - 1) * sH + 1:sH, :(OW - 1) * sW + 1:sW]        # (OC, N, OH, OW)
    return jnp.transpose(y, (1, 0, 2, 3))


if __name__ == "__main__":
    # args equivalent: IC=4, OC=8, kH=kW=3, sH=sW=1, padType=1 ('valid'), hasBias=1
    N, IC, OC = 2, 4, 8
    H = W = 16
    kH = kW = 3
    stride = (1, 1)

    key = jax.random.PRNGKey(0)
    kx, kw_, kb = jax.random.split(key, 3)
    x = jax.random.normal(kx, (N, IC, H, W), dtype=jnp.float32)
    # Deterministic weight/bias init (mimics nn.Conv2d uniform init bounds).
    fan_in = IC * kH * kW
    bound = 1.0 / (fan_in ** 0.5)
    w = jax.random.uniform(kw_, (OC, IC, kH, kW), jnp.float32, -bound, bound)
    b = jax.random.uniform(kb, (OC,), jnp.float32, -bound, bound)

    out = conv2d_pallas(x, w, b, stride=stride)
    out = jax.block_until_ready(out)

    ref = jax.lax.conv_general_dilated(
        x, w, window_strides=stride, padding="VALID",
        dimension_numbers=("NCHW", "OIHW", "NCHW")) + b[None, :, None, None]
    assert out.shape == (N, OC, H - kH + 1, W - kW + 1)
    assert out.dtype == x.dtype
    assert jnp.allclose(out, ref, atol=1e-5, rtol=1e-5)

    # Also exercise a strided configuration (sH=sW=2, NHW not a lane multiple).
    H2 = W2 = 9
    stride2 = (2, 2)
    x2 = jax.random.normal(kx, (N, IC, H2, W2), dtype=jnp.float32)
    out2 = jax.block_until_ready(conv2d_pallas(x2, w, b, stride=stride2))
    ref2 = jax.lax.conv_general_dilated(
        x2, w, window_strides=stride2, padding="VALID",
        dimension_numbers=("NCHW", "OIHW", "NCHW")) + b[None, :, None, None]
    assert out2.shape == ref2.shape
    assert jnp.allclose(out2, ref2, atol=1e-5, rtol=1e-5)

    print("KERNEL_OK")
</pallas_src>

<mosaic_0001>
module attributes {stable_mosaic.version = 11 : i64} {
  func.func @conv2d_kernel(%arg0: memref<8x640xf32, #tpu.memory_space<vmem>>, %arg1: memref<9x8x8xf32, #tpu.memory_space<vmem>>, %arg2: memref<8x1xf32, #tpu.memory_space<vmem>>, %arg3: memref<8x512xf32, #tpu.memory_space<vmem>>) attributes {dimension_semantics = [], scalar_prefetch = 0 : i64, scratch_operands = 0 : i64, tpu.core_type = #tpu.core_type<tc>} {
    %c0 = arith.constant 0 : index
    %c0_0 = arith.constant 0 : index
    %0 = vector.load %arg0[%c0, %c0_0] : memref<8x640xf32, #tpu.memory_space<vmem>>, vector<8x640xf32>
    %cst = arith.constant 0.000000e+00 : f32
    %1 = vector.broadcast %cst : f32 to vector<8x512xf32>
    %c0_1 = arith.constant 0 : index
    %c0_2 = arith.constant 0 : index
    %c0_3 = arith.constant 0 : index
    %2 = vector.load %arg1[%c0_1, %c0_2, %c0_3] : memref<9x8x8xf32, #tpu.memory_space<vmem>>, vector<1x8x8xf32>
    %3 = vector.shape_cast %2 : vector<1x8x8xf32> to vector<8x8xf32>
    %4 = vector.extract_strided_slice %0 {offsets = [0, 0], sizes = [8, 512], strides = [1, 1]} : vector<8x640xf32> to vector<8x512xf32>
    %cst_4 = arith.constant dense<0.000000e+00> : vector<8x512xf32>
    %5 = tpu.matmul %3, %4, %cst_4 {dimension_numbers = #tpu.dot_dimension_numbers<[1], [0], [0], [1], [0, 0, 1, 1], [], []>} : vector<8x8xf32>, vector<8x512xf32>, vector<8x512xf32> -> vector<8x512xf32>
    %6 = arith.addf %1, %5 : vector<8x512xf32>
    %c1 = arith.constant 1 : index
    %c0_5 = arith.constant 0 : index
    %c0_6 = arith.constant 0 : index
    %7 = vector.load %arg1[%c1, %c0_5, %c0_6] : memref<9x8x8xf32, #tpu.memory_space<vmem>>, vector<1x8x8xf32>
    %8 = vector.shape_cast %7 : vector<1x8x8xf32> to vector<8x8xf32>
    %9 = vector.extract_strided_slice %0 {offsets = [0, 1], sizes = [8, 512], strides = [1, 1]} : vector<8x640xf32> to vector<8x512xf32>
    %cst_7 = arith.constant dense<0.000000e+00> : vector<8x512xf32>
    %10 = tpu.matmul %8, %9, %cst_7 {dimension_numbers = #tpu.dot_dimension_numbers<[1], [0], [0], [1], [0, 0, 1, 1], [], []>} : vector<8x8xf32>, vector<8x512xf32>, vector<8x512xf32> -> vector<8x512xf32>
    %11 = arith.addf %6, %10 : vector<8x512xf32>
    %c2 = arith.constant 2 : index
    %c0_8 = arith.constant 0 : index
    %c0_9 = arith.constant 0 : index
    %12 = vector.load %arg1[%c2, %c0_8, %c0_9] : memref<9x8x8xf32, #tpu.memory_space<vmem>>, vector<1x8x8xf32>
    %13 = vector.shape_cast %12 : vector<1x8x8xf32> to vector<8x8xf32>
    %14 = vector.extract_strided_slice %0 {offsets = [0, 2], sizes = [8, 512], strides = [1, 1]} : vector<8x640xf32> to vector<8x512xf32>
    %cst_10 = arith.constant dense<0.000000e+00> : vector<8x512xf32>
    %15 = tpu.matmul %13, %14, %cst_10 {dimension_numbers = #tpu.dot_dimension_numbers<[1], [0], [0], [1], [0, 0, 1, 1], [], []>} : vector<8x8xf32>, vector<8x512xf32>, vector<8x512xf32> -> vector<8x512xf32>
    %16 = arith.addf %11, %15 : vector<8x512xf32>
    %c3 = arith.constant 3 : index
    %c0_11 = arith.constant 0 : index
    %c0_12 = arith.constant 0 : index
    %17 = vector.load %arg1[%c3, %c0_11, %c0_12] : memref<9x8x8xf32, #tpu.memory_space<vmem>>, vector<1x8x8xf32>
    %18 = vector.shape_cast %17 : vector<1x8x8xf32> to vector<8x8xf32>
    %19 = vector.extract_strided_slice %0 {offsets = [0, 16], sizes = [8, 512], strides = [1, 1]} : vector<8x640xf32> to vector<8x512xf32>
    %cst_13 = arith.constant dense<0.000000e+00> : vector<8x512xf32>
    %20 = tpu.matmul %18, %19, %cst_13 {dimension_numbers = #tpu.dot_dimension_numbers<[1], [0], [0], [1], [0, 0, 1, 1], [], []>} : vector<8x8xf32>, vector<8x512xf32>, vector<8x512xf32> -> vector<8x512xf32>
    %21 = arith.addf %16, %20 : vector<8x512xf32>
    %c4 = arith.constant 4 : index
    %c0_14 = arith.constant 0 : index
    %c0_15 = arith.constant 0 : index
    %22 = vector.load %arg1[%c4, %c0_14, %c0_15] : memref<9x8x8xf32, #tpu.memory_space<vmem>>, vector<1x8x8xf32>
    %23 = vector.shape_cast %22 : vector<1x8x8xf32> to vector<8x8xf32>
    %24 = vector.extract_strided_slice %0 {offsets = [0, 17], sizes = [8, 512], strides = [1, 1]} : vector<8x640xf32> to vector<8x512xf32>
    %cst_16 = arith.constant dense<0.000000e+00> : vector<8x512xf32>
    %25 = tpu.matmul %23, %24, %cst_16 {dimension_numbers = #tpu.dot_dimension_numbers<[1], [0], [0], [1], [0, 0, 1, 1], [], []>} : vector<8x8xf32>, vector<8x512xf32>, vector<8x512xf32> -> vector<8x512xf32>
    %26 = arith.addf %21, %25 : vector<8x512xf32>
    %c5 = arith.constant 5 : index
    %c0_17 = arith.constant 0 : index
    %c0_18 = arith.constant 0 : index
    %27 = vector.load %arg1[%c5, %c0_17, %c0_18] : memref<9x8x8xf32, #tpu.memory_space<vmem>>, vector<1x8x8xf32>
    %28 = vector.shape_cast %27 : vector<1x8x8xf32> to vector<8x8xf32>
    %29 = vector.extract_strided_slice %0 {offsets = [0, 18], sizes = [8, 512], strides = [1, 1]} : vector<8x640xf32> to vector<8x512xf32>
    %cst_19 = arith.constant dense<0.000000e+00> : vector<8x512xf32>
    %30 = tpu.matmul %28, %29, %cst_19 {dimension_numbers = #tpu.dot_dimension_numbers<[1], [0], [0], [1], [0, 0, 1, 1], [], []>} : vector<8x8xf32>, vector<8x512xf32>, vector<8x512xf32> -> vector<8x512xf32>
    %31 = arith.addf %26, %30 : vector<8x512xf32>
    %c6 = arith.constant 6 : index
    %c0_20 = arith.constant 0 : index
    %c0_21 = arith.constant 0 : index
    %32 = vector.load %arg1[%c6, %c0_20, %c0_21] : memref<9x8x8xf32, #tpu.memory_space<vmem>>, vector<1x8x8xf32>
    %33 = vector.shape_cast %32 : vector<1x8x8xf32> to vector<8x8xf32>
    %34 = vector.extract_strided_slice %0 {offsets = [0, 32], sizes = [8, 512], strides = [1, 1]} : vector<8x640xf32> to vector<8x512xf32>
    %cst_22 = arith.constant dense<0.000000e+00> : vector<8x512xf32>
    %35 = tpu.matmul %33, %34, %cst_22 {dimension_numbers = #tpu.dot_dimension_numbers<[1], [0], [0], [1], [0, 0, 1, 1], [], []>} : vector<8x8xf32>, vector<8x512xf32>, vector<8x512xf32> -> vector<8x512xf32>
    %36 = arith.addf %31, %35 : vector<8x512xf32>
    %c7 = arith.constant 7 : index
    %c0_23 = arith.constant 0 : index
    %c0_24 = arith.constant 0 : index
    %37 = vector.load %arg1[%c7, %c0_23, %c0_24] : memref<9x8x8xf32, #tpu.memory_space<vmem>>, vector<1x8x8xf32>
    %38 = vector.shape_cast %37 : vector<1x8x8xf32> to vector<8x8xf32>
    %39 = vector.extract_strided_slice %0 {offsets = [0, 33], sizes = [8, 512], strides = [1, 1]} : vector<8x640xf32> to vector<8x512xf32>
    %cst_25 = arith.constant dense<0.000000e+00> : vector<8x512xf32>
    %40 = tpu.matmul %38, %39, %cst_25 {dimension_numbers = #tpu.dot_dimension_numbers<[1], [0], [0], [1], [0, 0, 1, 1], [], []>} : vector<8x8xf32>, vector<8x512xf32>, vector<8x512xf32> -> vector<8x512xf32>
    %41 = arith.addf %36, %40 : vector<8x512xf32>
    %c8 = arith.constant 8 : index
    %c0_26 = arith.constant 0 : index
    %c0_27 = arith.constant 0 : index
    %42 = vector.load %arg1[%c8, %c0_26, %c0_27] : memref<9x8x8xf32, #tpu.memory_space<vmem>>, vector<1x8x8xf32>
    %43 = vector.shape_cast %42 : vector<1x8x8xf32> to vector<8x8xf32>
    %44 = vector.extract_strided_slice %0 {offsets = [0, 34], sizes = [8, 512], strides = [1, 1]} : vector<8x640xf32> to vector<8x512xf32>
    %cst_28 = arith.constant dense<0.000000e+00> : vector<8x512xf32>
    %45 = tpu.matmul %43, %44, %cst_28 {dimension_numbers = #tpu.dot_dimension_numbers<[1], [0], [0], [1], [0, 0, 1, 1], [], []>} : vector<8x8xf32>, vector<8x512xf32>, vector<8x512xf32> -> vector<8x512xf32>
    %46 = arith.addf %41, %45 : vector<8x512xf32>
    %c0_29 = arith.constant 0 : index
    %c0_30 = arith.constant 0 : index
    %47 = vector.load %arg2[%c0_29, %c0_30] : memref<8x1xf32, #tpu.memory_space<vmem>>, vector<8x1xf32>
    %48 = vector.broadcast %47 : vector<8x1xf32> to vector<8x512xf32>
    %49 = arith.addf %46, %48 : vector<8x512xf32>
    %c0_31 = arith.constant 0 : index
    %c0_32 = arith.constant 0 : index
    %50 = vector.load %arg3[%c0_31, %c0_32] : memref<8x512xf32, #tpu.memory_space<vmem>>, vector<8x512xf32>
    tpu.vector_store %arg3[%c0_31, %c0_32], %49 {strides = array<i32>} : memref<8x512xf32, #tpu.memory_space<vmem>>, vector<8x512xf32>,
    return
  }
}

</mosaic_0001>

<bundles_post_ra>
// kernel: conv2d_pallas.1
= control target key start
LH: loop header
LB: loop body
LE: loop exit
PB: predicated region body
PF: predicated region fallthrough
CT: control target
= control target key end

     0   :  { %v1614_v2 = vmov 0.0   ;;  %s1615_s16 = smov 127   ;;  %s1616_s23 = smov 126   ;;  %v1622_v6 = vmov 0   ;;  %vm37_vm0 = vcmask 1039360   ;;  %vm46_vm1 = vcmask 64512   ;;  %s1801_s0 = inlined_call_operand.vmem [shape: f32[8,640], index: 0, kind: input, shape index: {}]   ;;  %s1802_s2 = inlined_call_operand.vmem [shape: f32[8,1], index: 2, kind: input, shape index: {}]   ;;  %s1803_s1 = inlined_call_operand.vmem [shape: f32[9,8,8], index: 1, kind: input, shape index: {}]   ;;  %s1804_s3 = inlined_call_operand.vmem [shape: f32[8,512], index: 3, kind: output, shape index: {}]  }
   0x1   :  { %v1647_v0 = vld [vmem:[%s1801_s0 + $0x18] sm:$0xff]  ;;  %v1652_v1 = vld [vmem:[%s1801_s0 + $0x8] sm:$0xff]  ;;  %114 = vmatprep.mubr.f32.mxu0 %v1614_v2  ;;  %185 = vmatprep.mubr.f32.mxu1 %v1614_v2  ;;  %v18_v3 = vld [vmem:[%s1801_s0 + $0x20] sm:$0xff]  ;;  %s1617_s24 = smov 112   ;;  %s1619_s25 = smov 110   ;;  %vm349_vm2 = vcmask 1031168  }
   0x2   :  { %33 = vrot.lane.b32.xlu1 %v1647_v0, %s1615_s16  ;;  %29 = vrot.lane.b32.xlu0 %v1652_v1, %s1615_s16  ;;  %v1664_v4 = vld [vmem:[%s1801_s0 + $0x10] sm:$0xff]  ;;  %v1670_v5 = vld [vmem:[%s1801_s0] sm:$0xff]  ;;  %s1618_s0 = smov 111   ;;  %s1620_s26 = smov 96   ;;  %vm519_vm3 = vcmask 916480   ;;  %vm689_vm4 = vcmask 908288  }
   0x3   :  { %s1621_s27 = smov 95   ;;  %1613 = vset.pattern.permute.xlu0 %v1622_v6  ;;  %s1623_s28 = smov 94   ;;  %v1527_v7 = vld [vmem:[%s1802_s2] sm:$0xff]  ;;  %v1545_v15 = vld [vmem:[%s1803_s1 + $0x8] sm:$0xff]  ;;  %v1550_v31 = vld [vmem:[%s1803_s1 + $0x10] sm:$0xff]  ;;  %vm859_vm5 = vcmask 900096  }
   0x4   :  { %v19_v22 = vld [vmem:[%s1803_s1] sm:$0xff]  ;;  %v1553_v39 = vld [vmem:[%s1803_s1 + $0x18] sm:$0xff]  ;;  %v1559_v56 = vld [vmem:[%s1803_s1 + $0x28] sm:$0xff]  ;;  %vm1029_vm6 = vcmask 785408   ;;  %vm1199_vm7 = vcmask 777216   ;;  %vm1369_vm8 = vcmask 769024  }
   0x5   :  { %v1556_v47 = vld [vmem:[%s1803_s1 + $0x20] sm:$0xff] }
   0x6   :  { %35 = vrot.lane.b32.xlu1 %v18_v3, %s1615_s16  ;;  %31 = vrot.lane.b32.xlu0 %v1664_v4, %s1615_s16 }
   0xa   :  { %341 = vrot.lane.b32.xlu1 %v1652_v1, %s1616_s23  ;;  %27 = vrot.lane.b32.xlu0 %v1670_v5, %s1615_s16 }
   0xe   :  { %345 = vrot.lane.b32.xlu1 %v1647_v0, %s1616_s23  ;;  %343 = vrot.lane.b32.xlu0 %v1664_v4, %s1616_s23 }
  0x12   :  { %339 = vrot.lane.b32.xlu1 %v1670_v5, %s1616_s23  ;;  %347 = vrot.lane.b32.xlu0 %v18_v3, %s1616_s23 }
  0x16   :  { %513 = vrot.lane.b32.xlu1 %v1664_v4, %s1617_s24  ;;  %511 = vrot.lane.b32.xlu0 %v1652_v1, %s1617_s24 }
  0x1a   :  { %517 = vrot.lane.b32.xlu1 %v18_v3, %s1617_s24  ;;  %515 = vrot.lane.b32.xlu0 %v1647_v0, %s1617_s24 }
  0x1e   :  { %681 = vrot.lane.b32.xlu1 %v1652_v1, %s1618_s0  ;;  %509 = vrot.lane.b32.xlu0 %v1670_v5, %s1617_s24 }
  0x22   :  { %685 = vrot.lane.b32.xlu1 %v1647_v0, %s1618_s0  ;;  %683 = vrot.lane.b32.xlu0 %v1664_v4, %s1618_s0 }
  0x26   :  { %679 = vrot.lane.b32.xlu1 %v1670_v5, %s1618_s0  ;;  %687 = vrot.lane.b32.xlu0 %v18_v3, %s1618_s0 }
  0x2a   :  { %853 = vrot.lane.b32.xlu1 %v1664_v4, %s1619_s25  ;;  %851 = vrot.lane.b32.xlu0 %v1652_v1, %s1619_s25 }
  0x2e   :  { %857 = vrot.lane.b32.xlu1 %v18_v3, %s1619_s25  ;;  %855 = vrot.lane.b32.xlu0 %v1647_v0, %s1619_s25 }
  0x32   :  { %1021 = vrot.lane.b32.xlu1 %v1652_v1, %s1620_s26  ;;  %849 = vrot.lane.b32.xlu0 %v1670_v5, %s1619_s25 }
  0x36   :  { %1025 = vrot.lane.b32.xlu1 %v1647_v0, %s1620_s26  ;;  %1023 = vrot.lane.b32.xlu0 %v1664_v4, %s1620_s26 }
  0x3a   :  { %1019 = vrot.lane.b32.xlu1 %v1670_v5, %s1620_s26  ;;  %1027 = vrot.lane.b32.xlu0 %v18_v3, %s1620_s26 }
  0x3e   :  { %1193 = vrot.lane.b32.xlu1 %v1664_v4, %s1621_s27  ;;  %1191 = vrot.lane.b32.xlu0 %v1652_v1, %s1621_s27 }
  0x42   :  { %1197 = vrot.lane.b32.xlu1 %v18_v3, %s1621_s27  ;;  %1195 = vrot.lane.b32.xlu0 %v1647_v0, %s1621_s27 }
  0x46   :  { %1361 = vrot.lane.b32.xlu1 %v1652_v1, %s1623_s28  ;;  %1189 = vrot.lane.b32.xlu0 %v1670_v5, %s1621_s27 }
  0x4a   :  { %1365 = vrot.lane.b32.xlu1 %v1647_v0, %s1623_s28  ;;  %1363 = vrot.lane.b32.xlu0 %v1664_v4, %s1623_s28 }
  0x4e   :  { %1359 = vrot.lane.b32.xlu1 %v1670_v5, %s1623_s28  ;;  %1367 = vrot.lane.b32.xlu0 %v18_v3, %s1623_s28 }
  0x52   :  { %1530 = vperm.xlu0 %1613, %v1527_v7  }
  0x74   :  { %v34_v8 = vpop.permute.xlu1 %33  ;;  %v30_v9 = vpop.permute.xlu0 %29 }
  0x78   :  { %v36_v10 = vpop.permute.xlu1 %35  ;;  %v32_v11 = vpop.permute.xlu0 %31 }
  0x79   :  { %v39_v12 = vsel %vm37_vm0, %v30_v9, %v32_v11  ;;  %v41_v13 = vsel %vm37_vm0, %v34_v8, %v36_v10  ;;  %v40_v14 = vsel %vm37_vm0, %v32_v11, %v34_v8 }
  0x7a   :  { %50 = vmatprep.subr.mxu0 %v39_v12  ;;  %121 = vmatprep.subr.mxu1 %v41_v13  ;;  %v1565_v13 = vld [vmem:[%s1803_s1 + $0x38] sm:$0xff] }
  0x7b   :  { %122 = vmatpush1.msra.mxu1 %v40_v14 }
  0x7c   :  { %v342_v16 = vpop.permute.xlu1 %341  ;;  %v28_v17 = vpop.permute.xlu0 %27  ;;  %1547 = vmatmul.mubr.msk.f32.vlgmr.msra.gmra.mrb[0].mxu1 %vm46_vm1, %v1545_v15  ;;  %266 = vmatprep.subr.mxu1 %v1647_v0 }
  0x7d   :  { %v38_v18 = vsel %vm37_vm0, %v28_v17, %v30_v9  ;;  %267 = vmatpush1.msra.mxu1 %v1664_v4  ;;  %330 = vmatprep.mubr.f32.mxu1 %v1614_v2 }
  0x7e   :  { %51 = vmatpush1.msra.mxu0 %v38_v18 }
  0x7f   :  { %1546 = vmatmul.mubr.msk.f32.vlgmr.msra.gmra.mrb[0].mxu0 %vm46_vm1, %v1545_v15  ;;  %195 = vmatprep.subr.mxu0 %v1652_v1  ;;  %v1562_v1 = vld [vmem:[%s1803_s1 + $0x30] sm:$0xff] }
  0x80   :  { %v346_v19 = vpop.permute.xlu1 %345  ;;  %v344_v20 = vpop.permute.xlu0 %343  ;;  %196 = vmatpush1.msra.mxu0 %v1670_v5  ;;  %259 = vmatprep.mubr.f32.mxu0 %v1614_v2 }
  0x81   :  { %v351_v21 = vsel %vm349_vm2, %v342_v16, %v344_v20  ;;  %v352_v27 = vsel %vm349_vm2, %v344_v20, %v346_v19 }
  0x82   :  { %361 = vmatprep.subr.mxu0 %v351_v21 }
  0x84   :  { %v340_v23 = vpop.permute.xlu1 %339  ;;  %v348_v24 = vpop.permute.xlu0 %347  ;;  %1549 = vmatmul.mubr.msk.f32.vlgmr.msra.gmra.mrb[0].mxu1 %vm46_vm1, %v19_v22 }
  0x85   :  { %v350_v25 = vsel %vm349_vm2, %v340_v23, %v342_v16  ;;  %v353_v26 = vsel %vm349_vm2, %v346_v19, %v348_v24  ;;  %496 = vmatprep.mubr.f32.mxu1 %v1614_v2 }
  0x86   :  { %432 = vmatprep.subr.mxu1 %v353_v26 }
  0x87   :  { %1548 = vmatmul.mubr.msk.f32.vlgmr.msra.gmra.mrb[0].mxu0 %vm46_vm1, %v19_v22  ;;  %433 = vmatpush1.msra.mxu1 %v352_v27  ;;  %v1568_v22 = vld [vmem:[%s1803_s1 + $0x40] sm:$0xff] }
  0x88   :  { %362 = vmatpush1.msra.mxu0 %v350_v25  ;;  %v514_v28 = vpop.permute.xlu1 %513  ;;  %v512_v29 = vpop.permute.xlu0 %511  ;;  %425 = vmatprep.mubr.f32.mxu0 %v1614_v2 }
  0x89   :  { %v521_v30 = vsel %vm519_vm3, %v512_v29, %v514_v28 }
  0x8a   :  { %531 = vmatprep.subr.mxu0 %v521_v30 }
  0x8c   :  { %v518_v32 = vpop.permute.xlu1 %517  ;;  %v516_v33 = vpop.permute.xlu0 %515  ;;  %1552 = vmatmul.mubr.msk.f32.vlgmr.msra.gmra.mrb[0].mxu1 %vm46_vm1, %v1550_v31 }
  0x8d   :  { %v522_v34 = vsel %vm519_vm3, %v514_v28, %v516_v33  ;;  %v523_v35 = vsel %vm519_vm3, %v516_v33, %v518_v32  ;;  %666 = vmatprep.mubr.f32.mxu1 %v1614_v2 }
  0x8e   :  { %602 = vmatprep.subr.mxu1 %v523_v35 }
  0x8f   :  { %603 = vmatpush1.msra.mxu1 %v522_v34  ;;  %1551 = vmatmul.mubr.msk.f32.vlgmr.msra.gmra.mrb[0].mxu0 %vm46_vm1, %v1550_v31 }
  0x90   :  { %v682_v36 = vpop.permute.xlu1 %681  ;;  %v510_v37 = vpop.permute.xlu0 %509  ;;  %595 = vmatprep.mubr.f32.mxu0 %v1614_v2 }
  0x91   :  { %v520_v38 = vsel %vm519_vm3, %v510_v37, %v512_v29 }
  0x92   :  { %532 = vmatpush1.msra.mxu0 %v520_v38 }
  0x94   :  { %v686_v40 = vpop.permute.xlu1 %685  ;;  %v684_v41 = vpop.permute.xlu0 %683  ;;  %1555 = vmatmul.mubr.msk.f32.vlgmr.msra.gmra.mrb[0].mxu1 %vm46_vm1, %v1553_v39 }
  0x95   :  { %v691_v42 = vsel %vm689_vm4, %v682_v36, %v684_v41  ;;  %836 = vmatprep.mubr.f32.mxu1 %v1614_v2  ;;  %v692_v48 = vsel %vm689_vm4, %v684_v41, %v686_v40 }
  0x96   :  { %701 = vmatprep.subr.mxu0 %v691_v42 }
  0x97   :  { %1554 = vmatmul.mubr.msk.f32.vlgmr.msra.gmra.mrb[0].mxu0 %vm46_vm1, %v1553_v39 }
  0x98   :  { %v680_v43 = vpop.permute.xlu1 %679  ;;  %v688_v44 = vpop.permute.xlu0 %687  ;;  %765 = vmatprep.mubr.f32.mxu0 %v1614_v2 }
  0x99   :  { %v690_v45 = vsel %vm689_vm4, %v680_v43, %v682_v36  ;;  %v693_v46 = vsel %vm689_vm4, %v686_v40, %v688_v44 }
  0x9a   :  { %702 = vmatpush1.msra.mxu0 %v690_v45  ;;  %772 = vmatprep.subr.mxu1 %v693_v46 }
  0x9b   :  { %773 = vmatpush1.msra.mxu1 %v692_v48 }
  0x9c   :  { %v854_v49 = vpop.permute.xlu1 %853  ;;  %v852_v50 = vpop.permute.xlu0 %851  ;;  %1558 = vmatmul.mubr.msk.f32.vlgmr.msra.gmra.mrb[0].mxu1 %vm46_vm1, %v1556_v47 }
  0x9d   :  { %v861_v51 = vsel %vm859_vm5, %v852_v50, %v854_v49  ;;  %1006 = vmatprep.mubr.f32.mxu1 %v1614_v2 }
  0x9e   :  { %871 = vmatprep.subr.mxu0 %v861_v51 }
  0x9f   :  { %1557 = vmatmul.mubr.msk.f32.vlgmr.msra.gmra.mrb[0].mxu0 %vm46_vm1, %v1556_v47 }
  0xa0   :  { %v858_v52 = vpop.permute.xlu1 %857  ;;  %v856_v53 = vpop.permute.xlu0 %855  ;;  %935 = vmatprep.mubr.f32.mxu0 %v1614_v2 }
  0xa1   :  { %v862_v54 = vsel %vm859_vm5, %v854_v49, %v856_v53  ;;  %v863_v55 = vsel %vm859_vm5, %v856_v53, %v858_v52 }
  0xa2   :  { %942 = vmatprep.subr.mxu1 %v863_v55 }
  0xa3   :  { %943 = vmatpush1.msra.mxu1 %v862_v54 }
  0xa4   :  { %v1022_v57 = vpop.permute.xlu1 %1021  ;;  %v850_v58 = vpop.permute.xlu0 %849  ;;  %1561 = vmatmul.mubr.msk.f32.vlgmr.msra.gmra.mrb[0].mxu1 %vm46_vm1, %v1559_v56 }
  0xa5   :  { %v860_v59 = vsel %vm859_vm5, %v850_v58, %v852_v50  ;;  %1176 = vmatprep.mubr.f32.mxu1 %v1614_v2 }
  0xa6   :  { %872 = vmatpush1.msra.mxu0 %v860_v59 }
  0xa7   :  { %1560 = vmatmul.mubr.msk.f32.vlgmr.msra.gmra.mrb[0].mxu0 %vm46_vm1, %v1559_v56 }
  0xa8   :  { %v1026_v60 = vpop.permute.xlu1 %1025  ;;  %v1024_v61 = vpop.permute.xlu0 %1023  ;;  %1105 = vmatprep.mubr.f32.mxu0 %v1614_v2 }
  0xa9   :  { %v1031_v62 = vsel %vm1029_vm6, %v1022_v57, %v1024_v61  ;;  %v1032_v5 = vsel %vm1029_vm6, %v1024_v61, %v1026_v60 }
  0xaa   :  { %1041 = vmatprep.subr.mxu0 %v1031_v62 }
  0xac   :  { %v1020_v63 = vpop.permute.xlu1 %1019  ;;  %v1028_v0 = vpop.permute.xlu0 %1027 }
  0xad   :  { %v1030_v3 = vsel %vm1029_vm6, %v1020_v63, %v1022_v57  ;;  %v1033_v4 = vsel %vm1029_vm6, %v1026_v60, %v1028_v0 }
  0xae   :  { %1042 = vmatpush1.msra.mxu0 %v1030_v3  ;;  %1112 = vmatprep.subr.mxu1 %v1033_v4 }
  0xaf   :  { %1113 = vmatpush1.msra.mxu1 %v1032_v5  ;;  %1563 = vmatmul.mubr.msk.f32.vlgmr.msra.gmra.mrb[0].mxu0 %vm46_vm1, %v1562_v1 }
  0xb0   :  { %v1194_v6 = vpop.permute.xlu1 %1193  ;;  %v1192_v7 = vpop.permute.xlu0 %1191  ;;  %1564 = vmatmul.mubr.msk.f32.vlgmr.msra.gmra.mrb[0].mxu1 %vm46_vm1, %v1562_v1  ;;  %1275 = vmatprep.mubr.f32.mxu0 %v1614_v2 }
  0xb1   :  { %v1201_v8 = vsel %vm1199_vm7, %v1192_v7, %v1194_v6  ;;  %1346 = vmatprep.mubr.f32.mxu1 %v1614_v2 }
  0xb2   :  { %1211 = vmatprep.subr.mxu0 %v1201_v8 }
  0xb4   :  { %v1198_v9 = vpop.permute.xlu1 %1197  ;;  %v1196_v10 = vpop.permute.xlu0 %1195 }
  0xb5   :  { %v1202_v11 = vsel %vm1199_vm7, %v1194_v6, %v1196_v10  ;;  %v1203_v12 = vsel %vm1199_vm7, %v1196_v10, %v1198_v9 }
  0xb6   :  { %1282 = vmatprep.subr.mxu1 %v1203_v12 }
  0xb7   :  { %1283 = vmatpush1.msra.mxu1 %v1202_v11 }
  0xb8   :  { %v1362_v14 = vpop.permute.xlu1 %1361  ;;  %v1190_v15 = vpop.permute.xlu0 %1189  ;;  %1567 = vmatmul.mubr.msk.f32.vlgmr.msra.gmra.mrb[0].mxu1 %vm46_vm1, %v1565_v13 }
  0xb9   :  { %v1200_v16 = vsel %vm1199_vm7, %v1190_v15, %v1192_v7  ;;  %1516 = vmatprep.mubr.f32.mxu1 %v1614_v2 }
  0xba   :  { %1212 = vmatpush1.msra.mxu0 %v1200_v16 }
  0xbb   :  { %1566 = vmatmul.mubr.msk.f32.vlgmr.msra.gmra.mrb[0].mxu0 %vm46_vm1, %v1565_v13 }
  0xbc   :  { %v1366_v17 = vpop.permute.xlu1 %1365  ;;  %v1364_v18 = vpop.permute.xlu0 %1363  ;;  %1445 = vmatprep.mubr.f32.mxu0 %v1614_v2 }
  0xbd   :  { %v1371_v19 = vsel %vm1369_vm8, %v1362_v14, %v1364_v18  ;;  %v1372_v25 = vsel %vm1369_vm8, %v1364_v18, %v1366_v17 }
  0xbe   :  { %1381 = vmatprep.subr.mxu0 %v1371_v19 }
  0xc0   :  { %v1360_v20 = vpop.permute.xlu1 %1359  ;;  %v1368_v21 = vpop.permute.xlu0 %1367 }
  0xc1   :  { %v1370_v23 = vsel %vm1369_vm8, %v1360_v20, %v1362_v14  ;;  %v1373_v24 = vsel %vm1369_vm8, %v1366_v17, %v1368_v21 }
  0xc2   :  { %1382 = vmatpush1.msra.mxu0 %v1370_v23  ;;  %1452 = vmatprep.subr.mxu1 %v1373_v24 }
  0xc3   :  { %1569 = vmatmul.mubr.msk.f32.vlgmr.msra.gmra.mrb[0].mxu0 %vm46_vm1, %v1568_v22  ;;  %1453 = vmatpush1.msra.mxu1 %v1372_v25 }
  0xc4   :  { %1570 = vmatmul.mubr.msk.f32.vlgmr.msra.gmra.mrb[0].mxu1 %vm46_vm1, %v1568_v22 }
  0xd1   :  { %v1531_v26 = vpop.permute.xlu0 %1530 }
 0x196   :  { %v1447_v2 = vpop.f32.mrb[0].mxu0 }
 0x197   :  { %v1533_v27 = vadd.f32 %v1531_v26, %v1447_v2  ;;  %v1449_v28 = vpop.f32.mrb[1].mxu0  ;;  %v1518_v29 = vpop.f32.mrb[0].mxu1 }
 0x198   :  { %v1534_v30 = vadd.f32 %v1531_v26, %v1449_v28  ;;  %v1535_v31 = vadd.f32 %v1531_v26, %v1518_v29  ;;  %v1520_v32 = vpop.f32.mrb[1].mxu1 }
 0x199   :  { %1537 = vst [vmem:[%s1804_s3] sm:$0xff] %v1533_v27  ;;  %v1536_v33 = vadd.f32 %v1531_v26, %v1520_v32 }
 0x19a   :  { %1538 = vst [vmem:[%s1804_s3 + $0x8] sm:$0xff] %v1534_v30  ;;  %1539 = vst [vmem:[%s1804_s3 + $0x10] sm:$0xff] %v1535_v31 }
 0x19b   :  { %1540 = vst [vmem:[%s1804_s3 + $0x18] sm:$0xff] %v1536_v33 }

</bundles_post_ra>
